<compile_context>
chip_gen: v6e
topology: v6e:2x2x1
jax: 0.10.0
libtpu: 0.0.40
codegen_flags: <defaults>
</compile_context>

<pallas_src>
import jax
import jax.numpy as jnp
from jax.experimental import pallas as pl
from jax.experimental.pallas import tpu as pltpu


# ----------------------------- tile helpers --------------------------------

_LANE_TILES = (2048, 1024, 512, 256, 128)       # lane-dense (multiple of 128)
_SUBLANE_TILES = (512, 256, 128, 64, 32, 16, 8)  # multiple of 8


def _pick_lane_tile(L):
    for t in _LANE_TILES:
        if L % t == 0:
            return t
    return L                       # full-dim block (exempt from 128 alignment)


def _pick_sublane_tile(C, lane_tile, itemsize, budget_bytes=4 * 1024 * 1024):
    for t in _SUBLANE_TILES:
        if C % t == 0 and t * lane_tile * itemsize <= budget_bytes:
            return t
    return C                       # full-dim block (small / odd C)


# --------------------- kernel 1: pointwise Conv1d (k=1) --------------------

def _pointwise_conv_kernel(x_ref, w_ref, b_ref, o_ref):
    # x_ref: (1, C, Lt), w_ref: (C4, C), b_ref: (C4, 1), o_ref: (1, C4, Lt)
    x = x_ref[0]
    o = jnp.dot(w_ref[...], x, preferred_element_type=jnp.float32) + b_ref[...]
    o_ref[0] = o.astype(o_ref.dtype)


def pointwise_conv(x, w, b):
    """x: (B, C, L); w: (C4, C); b: (C4, 1) -> (B, C4, L) float32."""
    B, C, L = x.shape
    C4 = w.shape[0]
    Lt = _pick_lane_tile(L)
    return pl.pallas_call(
        _pointwise_conv_kernel,
        out_shape=jax.ShapeDtypeStruct((B, C4, L), jnp.float32),
        grid=(B, L // Lt),
        in_specs=[
            pl.BlockSpec((1, C, Lt), lambda b_, l_: (b_, 0, l_)),
            pl.BlockSpec((C4, C), lambda b_, l_: (0, 0)),
            pl.BlockSpec((C4, 1), lambda b_, l_: (0, 0)),
        ],
        out_specs=pl.BlockSpec((1, C4, Lt), lambda b_, l_: (b_, 0, l_)),
        compiler_params=pltpu.CompilerParams(
            dimension_semantics=("parallel", "parallel")),
    )(x, w, b)


# ------- kernel 2: dilated convs + final 1x1 conv (+folded BN), per batch ----

def _ta_tail_kernel(h1_ref, w2_ref, b2_ref, w3_ref, b3_ref, w4_ref, b4_ref,
                    ta_ref):
    h1 = h1_ref[0]                                   # (C4, L) float32
    c4 = h1.shape[0]

    def dilated_conv3(h, wk_ref, b):                 # k=3, dilation=4, pad=4
        n = h.shape[1]
        zeros = jnp.zeros((c4, 4), h.dtype)
        hp = jnp.concatenate([zeros, h, zeros], axis=-1)        # (C4, n + 8)
        out = jnp.dot(wk_ref[0], hp[:, 0:n], preferred_element_type=jnp.float32)
        out = out + jnp.dot(wk_ref[1], hp[:, 4:4 + n],
                            preferred_element_type=jnp.float32)
        out = out + jnp.dot(wk_ref[2], hp[:, 8:8 + n],
                            preferred_element_type=jnp.float32)
        return out + b

    h2 = dilated_conv3(h1, w2_ref, b2_ref[...])      # (C4, L)
    h3 = dilated_conv3(h2, w3_ref, b3_ref[...])      # (C4, L)
    ta = jnp.dot(w4_ref[...], h3, preferred_element_type=jnp.float32) + b4_ref[...]
    ta_ref[0] = ta.astype(ta_ref.dtype)              # (1, L)


def ta_tail(h1, w2, b2, w3, b3, w4, b4):
    """h1: (B, C4, L); w2/w3: (3, C4, C4); b2/b3: (C4,1); w4: (1, C4); b4: (1,1)."""
    B, C4, L = h1.shape
    return pl.pallas_call(
        _ta_tail_kernel,
        out_shape=jax.ShapeDtypeStruct((B, 1, L), jnp.float32),
        grid=(B,),
        in_specs=[
            pl.BlockSpec((1, C4, L), lambda b_: (b_, 0, 0)),
            pl.BlockSpec((3, C4, C4), lambda b_: (0, 0, 0)),
            pl.BlockSpec((C4, 1), lambda b_: (0, 0)),
            pl.BlockSpec((3, C4, C4), lambda b_: (0, 0, 0)),
            pl.BlockSpec((C4, 1), lambda b_: (0, 0)),
            pl.BlockSpec((1, C4), lambda b_: (0, 0)),
            pl.BlockSpec((1, 1), lambda b_: (0, 0)),
        ],
        out_specs=pl.BlockSpec((1, 1, L), lambda b_: (b_, 0, 0)),
        compiler_params=pltpu.CompilerParams(dimension_semantics=("parallel",)),
    )(h1, w2, b2, w3, b3, w4, b4)


# ------------- kernel 3: fused lane-dense streaming scale pass ---------------

def _bam_scale_kernel(x_ref, g_ref, h_ref, ta_ref, o_ref):
    # x: (1, Ct, Lt) native dtype; g/h: (1, Ct, 1) f32; ta: (1, 1, Lt) f32
    x = x_ref[...]
    dt = x.dtype
    ca = g_ref[...].astype(dt) * x + h_ref[...].astype(dt)
    o_ref[...] = (ca * ta_ref[...].astype(dt) * x + x).astype(o_ref.dtype)


def bam_scale(x, gate, shift, ta):
    """x: (B,C,L); gate: (B,C,1); shift: (1,C,1); ta: (B,1,L) -> (B,C,L)."""
    B, C, L = x.shape
    itemsize = x.dtype.itemsize
    Lt = _pick_lane_tile(L)
    Ct = _pick_sublane_tile(C, Lt, itemsize)
    nbytes = x.size * itemsize
    cost = pl.CostEstimate(
        flops=5 * x.size,
        transcendentals=0,
        bytes_accessed=2 * nbytes + 4 * (gate.size + shift.size + ta.size),
    )
    return pl.pallas_call(
        _bam_scale_kernel,
        out_shape=jax.ShapeDtypeStruct((B, C, L), x.dtype),
        grid=(B, C // Ct, L // Lt),
        in_specs=[
            pl.BlockSpec((1, Ct, Lt), lambda b_, c_, l_: (b_, c_, l_)),
            pl.BlockSpec((1, Ct, 1), lambda b_, c_, l_: (b_, c_, 0)),
            pl.BlockSpec((1, Ct, 1), lambda b_, c_, l_: (0, c_, 0)),
            pl.BlockSpec((1, 1, Lt), lambda b_, c_, l_: (b_, 0, l_)),
        ],
        out_specs=pl.BlockSpec((1, Ct, Lt), lambda b_, c_, l_: (b_, c_, l_)),
        compiler_params=pltpu.CompilerParams(
            dimension_semantics=("parallel", "parallel", "parallel")),
        cost_estimate=cost,
    )(x, gate, shift, ta)


# ------------------------------- BAM forward --------------------------------

def bam_forward(x, p):
    """BAM forward.  x: (B, C, L).  Weight layouts documented in __main__."""
    eps = p["eps"]

    # --- channel-attention gates: squeeze + excite (batched tiny MLP in XLA),
    #     with the following BatchNorm1d(C) folded to per-channel affine. ---
    y = jnp.mean(x.astype(jnp.float32), axis=-1)                    # (B, C)
    hse = jnp.maximum(y @ p["se_w1"] + p["se_b1"], 0.0)             # (B, Cr)
    s = jax.nn.sigmoid(hse @ p["se_w2"] + p["se_b2"])               # (B, C)
    bn_scale = p["bn_ca_gamma"] * jax.lax.rsqrt(p["bn_ca_var"] + eps)
    bn_shift = p["bn_ca_beta"] - p["bn_ca_mean"] * bn_scale
    gate = (s * bn_scale[None, :])[:, :, None]                      # (B, C, 1)
    shift = bn_shift[None, :, None]                                 # (1, C, 1)

    # --- temporal-attention branch (Pallas conv stack, BN(1) folded). ---
    h1 = pointwise_conv(x, p["ta_w1"], p["ta_b1"][:, None])          # (B, C4, L)
    bnt_scale = p["bn_ta_gamma"] * jax.lax.rsqrt(p["bn_ta_var"] + eps)
    bnt_shift = p["bn_ta_beta"] - p["bn_ta_mean"] * bnt_scale
    w4_eff = p["ta_w4"] * bnt_scale                                  # (1, C4)
    b4_eff = (p["ta_b4"] * bnt_scale + bnt_shift).reshape(1, 1)
    ta = ta_tail(
        h1,
        jnp.transpose(p["ta_w2"], (2, 0, 1)), p["ta_b2"][:, None],
        jnp.transpose(p["ta_w3"], (2, 0, 1)), p["ta_b3"][:, None],
        w4_eff, b4_eff,
    )                                                                # (B, 1, L)

    # --- fused streaming scale: out = ca * ta * x + x ---
    return bam_scale(x, gate, shift, ta)


# ------------------------------ pure-JAX reference ---------------------------

def _conv1d_ref(x, w, b, dilation=1, padding=0):
    out = jax.lax.conv_general_dilated(
        x, w, window_strides=(1,), padding=[(padding, padding)],
        rhs_dilation=(dilation,), dimension_numbers=("NCH", "OIH", "NCH"))
    return out + b[None, :, None]


def bam_ref(x, p):
    eps = p["eps"]
    # SELayer
    y = jnp.mean(x, axis=-1)
    hse = jnp.maximum(y @ p["se_w1"] + p["se_b1"], 0.0)
    s = jax.nn.sigmoid(hse @ p["se_w2"] + p["se_b2"])
    se = x * s[:, :, None]
    # BatchNorm1d(C) (inference mode)
    ca = ((se - p["bn_ca_mean"][None, :, None])
          * jax.lax.rsqrt(p["bn_ca_var"][None, :, None] + eps)
          * p["bn_ca_gamma"][None, :, None] + p["bn_ca_beta"][None, :, None])
    # ta branch
    t = _conv1d_ref(x, p["ta_w1"][:, :, None], p["ta_b1"])
    t = _conv1d_ref(t, p["ta_w2"], p["ta_b2"], dilation=4, padding=4)
    t = _conv1d_ref(t, p["ta_w3"], p["ta_b3"], dilation=4, padding=4)
    t = _conv1d_ref(t, p["ta_w4"][:, :, None], p["ta_b4"])
    ta = ((t - p["bn_ta_mean"][None, :, None])
          * jax.lax.rsqrt(p["bn_ta_var"][None, :, None] + eps)
          * p["bn_ta_gamma"][None, :, None] + p["bn_ta_beta"][None, :, None])
    return ca * ta * x + x


if __name__ == "__main__":
    # Small shapes consistent with the module: in_channels=32 -> SE hidden 8,
    # ta-branch bottleneck C/4 = 8, batch=2, length=256.
    B, C, L = 2, 32, 256
    Cr = C // 4      # SELayer reduction=4
    C4 = C // 4      # BAM ta-branch bottleneck

    key = jax.random.PRNGKey(0)
    keys = jax.random.split(key, 20)

    def rnd(i, shape, scale=0.1):
        return scale * jax.random.normal(keys[i], shape, dtype=jnp.float32)

    x = jax.random.normal(keys[0], (B, C, L), dtype=jnp.float32)

    params = dict(
        eps=1e-5,
        # SELayer fc (weights stored transposed vs PyTorch (out,in)):
        se_w1=rnd(1, (C, Cr)), se_b1=rnd(2, (Cr,)),
        se_w2=rnd(3, (Cr, C)), se_b2=rnd(4, (C,)),
        # BatchNorm1d(C) after the SE layer (running stats, eval mode):
        bn_ca_gamma=1.0 + rnd(5, (C,)), bn_ca_beta=rnd(6, (C,)),
        bn_ca_mean=rnd(7, (C,)),
        bn_ca_var=1.0 + 0.1 * jnp.abs(jax.random.normal(keys[8], (C,))),
        # ta-branch convs, PyTorch (out,in,k) layout (k=1 stored as (out,in)):
        ta_w1=rnd(9, (C4, C)), ta_b1=rnd(10, (C4,)),
        ta_w2=rnd(11, (C4, C4, 3)), ta_b2=rnd(12, (C4,)),
        ta_w3=rnd(13, (C4, C4, 3)), ta_b3=rnd(14, (C4,)),
        ta_w4=rnd(15, (1, C4)), ta_b4=rnd(16, (1,)),
        # BatchNorm1d(1) at the end of the ta branch:
        bn_ta_gamma=1.0 + rnd(17, (1,)), bn_ta_beta=rnd(18, (1,)),
        bn_ta_mean=rnd(19, (1,)), bn_ta_var=jnp.ones((1,), jnp.float32),
    )

    out = jax.jit(bam_forward)(x, params)
    out = jax.block_until_ready(out)

    ref = bam_ref(x, params)
    assert out.shape == (B, C, L)
    max_err = float(jnp.max(jnp.abs(out - ref)))
    assert jnp.allclose(out, ref, atol=1e-4, rtol=1e-4), f"mismatch vs ref: {max_err}"

    print("KERNEL_OK")
</pallas_src>

<mosaic_0001>
module attributes {stable_mosaic.version = 11 : i64} {
  func.func @_ta_tail_kernel(%arg0: i32, %arg1: memref<1x8x256xf32, #tpu.memory_space<vmem>>, %arg2: memref<3x8x8xf32, #tpu.memory_space<vmem>>, %arg3: memref<8x1xf32, #tpu.memory_space<vmem>>, %arg4: memref<3x8x8xf32, #tpu.memory_space<vmem>>, %arg5: memref<8x1xf32, #tpu.memory_space<vmem>>, %arg6: memref<1x8xf32, #tpu.memory_space<vmem>>, %arg7: memref<1x1xf32, #tpu.memory_space<vmem>>, %arg8: memref<1x1x256xf32, #tpu.memory_space<vmem>>) attributes {dimension_semantics = [#tpu.dimension_semantics<parallel>], iteration_bounds = array<i64: 2>, scalar_prefetch = 0 : i64, scratch_operands = 0 : i64, tpu.core_type = #tpu.core_type<tc>, window_params = [{transform_indices = @transform_0, window_bounds = array<i64: 1, 8, 256>}, {pipeline_mode = #tpu.pipeline_mode<synchronous>, transform_indices = @transform_1, window_bounds = array<i64: 3, 8, 8>}, {pipeline_mode = #tpu.pipeline_mode<synchronous>, transform_indices = @transform_2, window_bounds = array<i64: 8, 1>}, {pipeline_mode = #tpu.pipeline_mode<synchronous>, transform_indices = @transform_3, window_bounds = array<i64: 3, 8, 8>}, {pipeline_mode = #tpu.pipeline_mode<synchronous>, transform_indices = @transform_4, window_bounds = array<i64: 8, 1>}, {pipeline_mode = #tpu.pipeline_mode<synchronous>, transform_indices = @transform_5, window_bounds = array<i64: 1, 8>}, {pipeline_mode = #tpu.pipeline_mode<synchronous>, transform_indices = @transform_6, window_bounds = array<i64: 1, 1>}, {transform_indices = @transform_7, window_bounds = array<i64: 1, 1, 256>}]} {
    %c0 = arith.constant 0 : index
    %c0_0 = arith.constant 0 : index
    %c0_1 = arith.constant 0 : index
    %0 = vector.load %arg1[%c0, %c0_0, %c0_1] : memref<1x8x256xf32, #tpu.memory_space<vmem>>, vector<1x8x256xf32>
    %1 = vector.shape_cast %0 : vector<1x8x256xf32> to vector<8x256xf32>
    %c0_2 = arith.constant 0 : index
    %c0_3 = arith.constant 0 : index
    %2 = vector.load %arg3[%c0_2, %c0_3] : memref<8x1xf32, #tpu.memory_space<vmem>>, vector<8x1xf32>
    %cst = arith.constant 0.000000e+00 : f32
    %3 = vector.broadcast %cst : f32 to vector<8x4xf32>
    %4 = tpu.concatenate %3, %1, %3 in 1 : vector<8x4xf32>, vector<8x256xf32>, vector<8x4xf32> -> vector<8x264xf32>
    %c0_4 = arith.constant 0 : index
    %c0_5 = arith.constant 0 : index
    %c0_6 = arith.constant 0 : index
    %5 = vector.load %arg2[%c0_4, %c0_5, %c0_6] : memref<3x8x8xf32, #tpu.memory_space<vmem>>, vector<1x8x8xf32>
    %6 = vector.shape_cast %5 : vector<1x8x8xf32> to vector<8x8xf32>
    %7 = vector.extract_strided_slice %4 {offsets = [0, 0], sizes = [8, 256], strides = [1, 1]} : vector<8x264xf32> to vector<8x256xf32>
    %cst_7 = arith.constant dense<0.000000e+00> : vector<8x256xf32>
    %8 = tpu.matmul %6, %7, %cst_7 {dimension_numbers = #tpu.dot_dimension_numbers<[1], [0], [0], [1], [0, 0, 1, 1], [], []>} : vector<8x8xf32>, vector<8x256xf32>, vector<8x256xf32> -> vector<8x256xf32>
    %c1 = arith.constant 1 : index
    %c0_8 = arith.constant 0 : index
    %c0_9 = arith.constant 0 : index
    %9 = vector.load %arg2[%c1, %c0_8, %c0_9] : memref<3x8x8xf32, #tpu.memory_space<vmem>>, vector<1x8x8xf32>
    %10 = vector.shape_cast %9 : vector<1x8x8xf32> to vector<8x8xf32>
    %11 = vector.extract_strided_slice %4 {offsets = [0, 4], sizes = [8, 256], strides = [1, 1]} : vector<8x264xf32> to vector<8x256xf32>
    %cst_10 = arith.constant dense<0.000000e+00> : vector<8x256xf32>
    %12 = tpu.matmul %10, %11, %cst_10 {dimension_numbers = #tpu.dot_dimension_numbers<[1], [0], [0], [1], [0, 0, 1, 1], [], []>} : vector<8x8xf32>, vector<8x256xf32>, vector<8x256xf32> -> vector<8x256xf32>
    %13 = arith.addf %8, %12 : vector<8x256xf32>
    %c2 = arith.constant 2 : index
    %c0_11 = arith.constant 0 : index
    %c0_12 = arith.constant 0 : index
    %14 = vector.load %arg2[%c2, %c0_11, %c0_12] : memref<3x8x8xf32, #tpu.memory_space<vmem>>, vector<1x8x8xf32>
    %15 = vector.shape_cast %14 : vector<1x8x8xf32> to vector<8x8xf32>
    %16 = vector.extract_strided_slice %4 {offsets = [0, 8], sizes = [8, 256], strides = [1, 1]} : vector<8x264xf32> to vector<8x256xf32>
    %cst_13 = arith.constant dense<0.000000e+00> : vector<8x256xf32>
    %17 = tpu.matmul %15, %16, %cst_13 {dimension_numbers = #tpu.dot_dimension_numbers<[1], [0], [0], [1], [0, 0, 1, 1], [], []>} : vector<8x8xf32>, vector<8x256xf32>, vector<8x256xf32> -> vector<8x256xf32>
    %18 = arith.addf %13, %17 : vector<8x256xf32>
    %19 = vector.broadcast %2 : vector<8x1xf32> to vector<8x256xf32>
    %20 = arith.addf %18, %19 : vector<8x256xf32>
    %c0_14 = arith.constant 0 : index
    %c0_15 = arith.constant 0 : index
    %21 = vector.load %arg5[%c0_14, %c0_15] : memref<8x1xf32, #tpu.memory_space<vmem>>, vector<8x1xf32>
    %cst_16 = arith.constant 0.000000e+00 : f32
    %22 = vector.broadcast %cst_16 : f32 to vector<8x4xf32>
    %23 = tpu.concatenate %22, %20, %22 in 1 : vector<8x4xf32>, vector<8x256xf32>, vector<8x4xf32> -> vector<8x264xf32>
    %c0_17 = arith.constant 0 : index
    %c0_18 = arith.constant 0 : index
    %c0_19 = arith.constant 0 : index
    %24 = vector.load %arg4[%c0_17, %c0_18, %c0_19] : memref<3x8x8xf32, #tpu.memory_space<vmem>>, vector<1x8x8xf32>
    %25 = vector.shape_cast %24 : vector<1x8x8xf32> to vector<8x8xf32>
    %26 = vector.extract_strided_slice %23 {offsets = [0, 0], sizes = [8, 256], strides = [1, 1]} : vector<8x264xf32> to vector<8x256xf32>
    %cst_20 = arith.constant dense<0.000000e+00> : vector<8x256xf32>
    %27 = tpu.matmul %25, %26, %cst_20 {dimension_numbers = #tpu.dot_dimension_numbers<[1], [0], [0], [1], [0, 0, 1, 1], [], []>} : vector<8x8xf32>, vector<8x256xf32>, vector<8x256xf32> -> vector<8x256xf32>
    %c1_21 = arith.constant 1 : index
    %c0_22 = arith.constant 0 : index
    %c0_23 = arith.constant 0 : index
    %28 = vector.load %arg4[%c1_21, %c0_22, %c0_23] : memref<3x8x8xf32, #tpu.memory_space<vmem>>, vector<1x8x8xf32>
    %29 = vector.shape_cast %28 : vector<1x8x8xf32> to vector<8x8xf32>
    %30 = vector.extract_strided_slice %23 {offsets = [0, 4], sizes = [8, 256], strides = [1, 1]} : vector<8x264xf32> to vector<8x256xf32>
    %cst_24 = arith.constant dense<0.000000e+00> : vector<8x256xf32>
    %31 = tpu.matmul %29, %30, %cst_24 {dimension_numbers = #tpu.dot_dimension_numbers<[1], [0], [0], [1], [0, 0, 1, 1], [], []>} : vector<8x8xf32>, vector<8x256xf32>, vector<8x256xf32> -> vector<8x256xf32>
    %32 = arith.addf %27, %31 : vector<8x256xf32>
    %c2_25 = arith.constant 2 : index
    %c0_26 = arith.constant 0 : index
    %c0_27 = arith.constant 0 : index
    %33 = vector.load %arg4[%c2_25, %c0_26, %c0_27] : memref<3x8x8xf32, #tpu.memory_space<vmem>>, vector<1x8x8xf32>
    %34 = vector.shape_cast %33 : vector<1x8x8xf32> to vector<8x8xf32>
    %35 = vector.extract_strided_slice %23 {offsets = [0, 8], sizes = [8, 256], strides = [1, 1]} : vector<8x264xf32> to vector<8x256xf32>
    %cst_28 = arith.constant dense<0.000000e+00> : vector<8x256xf32>
    %36 = tpu.matmul %34, %35, %cst_28 {dimension_numbers = #tpu.dot_dimension_numbers<[1], [0], [0], [1], [0, 0, 1, 1], [], []>} : vector<8x8xf32>, vector<8x256xf32>, vector<8x256xf32> -> vector<8x256xf32>
    %37 = arith.addf %32, %36 : vector<8x256xf32>
    %38 = vector.broadcast %21 : vector<8x1xf32> to vector<8x256xf32>
    %39 = arith.addf %37, %38 : vector<8x256xf32>
    %c0_29 = arith.constant 0 : index
    %c0_30 = arith.constant 0 : index
    %40 = vector.load %arg6[%c0_29, %c0_30] : memref<1x8xf32, #tpu.memory_space<vmem>>, vector<1x8xf32>
    %cst_31 = arith.constant dense<0.000000e+00> : vector<1x256xf32>
    %41 = tpu.matmul %40, %39, %cst_31 {dimension_numbers = #tpu.dot_dimension_numbers<[1], [0], [0], [1], [0, 0, 1, 1], [], []>} : vector<1x8xf32>, vector<8x256xf32>, vector<1x256xf32> -> vector<1x256xf32>
    %c0_32 = arith.constant 0 : index
    %c0_33 = arith.constant 0 : index
    %42 = vector.load %arg7[%c0_32, %c0_33] : memref<1x1xf32, #tpu.memory_space<vmem>>, vector<1x1xf32>
    %43 = vector.broadcast %42 : vector<1x1xf32> to vector<1x256xf32>
    %44 = arith.addf %41, %43 : vector<1x256xf32>
    %c0_34 = arith.constant 0 : index
    %c0_35 = arith.constant 0 : index
    %c0_36 = arith.constant 0 : index
    %45 = vector.load %arg8[%c0_34, %c0_35, %c0_36] : memref<1x1x256xf32, #tpu.memory_space<vmem>>, vector<1x1x256xf32>
    %46 = vector.shape_cast %45 : vector<1x1x256xf32> to vector<1x256xf32>
    %47 = vector.shape_cast %44 : vector<1x256xf32> to vector<1x1x256xf32>
    tpu.vector_store %arg8[%c0_34, %c0_35, %c0_36], %47 {strides = array<i32>} : memref<1x1x256xf32, #tpu.memory_space<vmem>>, vector<1x1x256xf32>,
    return
  }
  func.func @transform_0(%arg0: i32) -> (i32, i32, i32) {
    %c0_i32 = arith.constant 0 : i32
    %c0_i32_0 = arith.constant 0 : i32
    %c0_i32_1 = arith.constant 0 : i32
    return %arg0, %c0_i32, %c0_i32_0 : i32, i32, i32
  }
  func.func @transform_1(%arg0: i32) -> (i32, i32, i32) {
    %c0_i32 = arith.constant 0 : i32
    %c0_i32_0 = arith.constant 0 : i32
    %c0_i32_1 = arith.constant 0 : i32
    %c0_i32_2 = arith.constant 0 : i32
    return %c0_i32, %c0_i32_0, %c0_i32_1 : i32, i32, i32
  }
  func.func @transform_2(%arg0: i32) -> (i32, i32) {
    %c0_i32 = arith.constant 0 : i32
    %c0_i32_0 = arith.constant 0 : i32
    %c0_i32_1 = arith.constant 0 : i32
    return %c0_i32, %c0_i32_0 : i32, i32
  }
  func.func @transform_3(%arg0: i32) -> (i32, i32, i32) {
    %c0_i32 = arith.constant 0 : i32
    %c0_i32_0 = arith.constant 0 : i32
    %c0_i32_1 = arith.constant 0 : i32
    %c0_i32_2 = arith.constant 0 : i32
    return %c0_i32, %c0_i32_0, %c0_i32_1 : i32, i32, i32
  }
  func.func @transform_4(%arg0: i32) -> (i32, i32) {
    %c0_i32 = arith.constant 0 : i32
    %c0_i32_0 = arith.constant 0 : i32
    %c0_i32_1 = arith.constant 0 : i32
    return %c0_i32, %c0_i32_0 : i32, i32
  }
  func.func @transform_5(%arg0: i32) -> (i32, i32) {
    %c0_i32 = arith.constant 0 : i32
    %c0_i32_0 = arith.constant 0 : i32
    %c0_i32_1 = arith.constant 0 : i32
    return %c0_i32, %c0_i32_0 : i32, i32
  }
  func.func @transform_6(%arg0: i32) -> (i32, i32) {
    %c0_i32 = arith.constant 0 : i32
    %c0_i32_0 = arith.constant 0 : i32
    %c0_i32_1 = arith.constant 0 : i32
    return %c0_i32, %c0_i32_0 : i32, i32
  }
  func.func @transform_7(%arg0: i32) -> (i32, i32, i32) {
    %c0_i32 = arith.constant 0 : i32
    %c0_i32_0 = arith.constant 0 : i32
    %c0_i32_1 = arith.constant 0 : i32
    return %arg0, %c0_i32, %c0_i32_0 : i32, i32, i32
  }
}

module attributes {stable_mosaic.version = 11 : i64} {
  func.func @_pointwise_conv_kernel(%arg0: i32, %arg1: i32, %arg2: memref<1x32x256xf32, #tpu.memory_space<vmem>>, %arg3: memref<8x32xf32, #tpu.memory_space<vmem>>, %arg4: memref<8x1xf32, #tpu.memory_space<vmem>>, %arg5: memref<1x8x256xf32, #tpu.memory_space<vmem>>) attributes {dimension_semantics = [#tpu.dimension_semantics<parallel>, #tpu.dimension_semantics<parallel>], iteration_bounds = array<i64: 2, 1>, scalar_prefetch = 0 : i64, scratch_operands = 0 : i64, tpu.core_type = #tpu.core_type<tc>, window_params = [{transform_indices = @transform_0, window_bounds = array<i64: 1, 32, 256>}, {pipeline_mode = #tpu.pipeline_mode<synchronous>, transform_indices = @transform_1, window_bounds = array<i64: 8, 32>}, {pipeline_mode = #tpu.pipeline_mode<synchronous>, transform_indices = @transform_2, window_bounds = array<i64: 8, 1>}, {transform_indices = @transform_3, window_bounds = array<i64: 1, 8, 256>}]} {
    %c0 = arith.constant 0 : index
    %c0_0 = arith.constant 0 : index
    %c0_1 = arith.constant 0 : index
    %0 = vector.load %arg2[%c0, %c0_0, %c0_1] : memref<1x32x256xf32, #tpu.memory_space<vmem>>, vector<1x32x256xf32>
    %1 = vector.shape_cast %0 : vector<1x32x256xf32> to vector<32x256xf32>
    %c0_2 = arith.constant 0 : index
    %c0_3 = arith.constant 0 : index
    %2 = vector.load %arg3[%c0_2, %c0_3] : memref<8x32xf32, #tpu.memory_space<vmem>>, vector<8x32xf32>
    %cst = arith.constant dense<0.000000e+00> : vector<8x256xf32>
    %3 = tpu.matmul %2, %1, %cst {dimension_numbers = #tpu.dot_dimension_numbers<[1], [0], [0], [1], [0, 0, 1, 1], [], []>} : vector<8x32xf32>, vector<32x256xf32>, vector<8x256xf32> -> vector<8x256xf32>
    %c0_4 = arith.constant 0 : index
    %c0_5 = arith.constant 0 : index
    %4 = vector.load %arg4[%c0_4, %c0_5] : memref<8x1xf32, #tpu.memory_space<vmem>>, vector<8x1xf32>
    %5 = vector.broadcast %4 : vector<8x1xf32> to vector<8x256xf32>
    %6 = arith.addf %3, %5 : vector<8x256xf32>
    %c0_6 = arith.constant 0 : index
    %c0_7 = arith.constant 0 : index
    %c0_8 = arith.constant 0 : index
    %7 = vector.load %arg5[%c0_6, %c0_7, %c0_8] : memref<1x8x256xf32, #tpu.memory_space<vmem>>, vector<1x8x256xf32>
    %8 = vector.shape_cast %7 : vector<1x8x256xf32> to vector<8x256xf32>
    %9 = vector.shape_cast %6 : vector<8x256xf32> to vector<1x8x256xf32>
    tpu.vector_store %arg5[%c0_6, %c0_7, %c0_8], %9 {strides = array<i32>} : memref<1x8x256xf32, #tpu.memory_space<vmem>>, vector<1x8x256xf32>,
    return
  }
  func.func @transform_0(%arg0: i32, %arg1: i32) -> (i32, i32, i32) {
    %c0_i32 = arith.constant 0 : i32
    %c0_i32_0 = arith.constant 0 : i32
    return %arg0, %c0_i32, %arg1 : i32, i32, i32
  }
  func.func @transform_1(%arg0: i32, %arg1: i32) -> (i32, i32) {
    %c0_i32 = arith.constant 0 : i32
    %c0_i32_0 = arith.constant 0 : i32
    %c0_i32_1 = arith.constant 0 : i32
    return %c0_i32, %c0_i32_0 : i32, i32
  }
  func.func @transform_2(%arg0: i32, %arg1: i32) -> (i32, i32) {
    %c0_i32 = arith.constant 0 : i32
    %c0_i32_0 = arith.constant 0 : i32
    %c0_i32_1 = arith.constant 0 : i32
    return %c0_i32, %c0_i32_0 : i32, i32
  }
  func.func @transform_3(%arg0: i32, %arg1: i32) -> (i32, i32, i32) {
    %c0_i32 = arith.constant 0 : i32
    %c0_i32_0 = arith.constant 0 : i32
    return %arg0, %c0_i32, %arg1 : i32, i32, i32
  }
}

module attributes {stable_mosaic.version = 11 : i64} {
  func.func @_bam_scale_kernel(%arg0: i32, %arg1: i32, %arg2: i32, %arg3: memref<1x32x256xf32, #tpu.memory_space<vmem>>, %arg4: memref<1x32x1xf32, #tpu.memory_space<vmem>>, %arg5: memref<1x32x1xf32, #tpu.memory_space<vmem>>, %arg6: memref<1x1x256xf32, #tpu.memory_space<vmem>>, %arg7: memref<1x32x256xf32, #tpu.memory_space<vmem>>) attributes {dimension_semantics = [#tpu.dimension_semantics<parallel>, #tpu.dimension_semantics<parallel>, #tpu.dimension_semantics<parallel>], iteration_bounds = array<i64: 2, 1, 1>, scalar_prefetch = 0 : i64, scratch_operands = 0 : i64, tpu.core_type = #tpu.core_type<tc>, window_params = [{transform_indices = @transform_0, window_bounds = array<i64: 1, 32, 256>}, {transform_indices = @transform_1, window_bounds = array<i64: 1, 32, 1>}, {transform_indices = @transform_2, window_bounds = array<i64: 1, 32, 1>}, {transform_indices = @transform_3, window_bounds = array<i64: 1, 1, 256>}, {transform_indices = @transform_4, window_bounds = array<i64: 1, 32, 256>}]} {
    %c0 = arith.constant 0 : index
    %c0_0 = arith.constant 0 : index
    %c0_1 = arith.constant 0 : index
    %0 = vector.load %arg3[%c0, %c0_0, %c0_1] : memref<1x32x256xf32, #tpu.memory_space<vmem>>, vector<1x32x256xf32>
    %c0_2 = arith.constant 0 : index
    %c0_3 = arith.constant 0 : index
    %c0_4 = arith.constant 0 : index
    %1 = vector.load %arg4[%c0_2, %c0_3, %c0_4] : memref<1x32x1xf32, #tpu.memory_space<vmem>>, vector<1x32x1xf32>
    %2 = vector.broadcast %1 : vector<1x32x1xf32> to vector<1x32x256xf32>
    %3 = arith.mulf %2, %0 : vector<1x32x256xf32>
    %c0_5 = arith.constant 0 : index
    %c0_6 = arith.constant 0 : index
    %c0_7 = arith.constant 0 : index
    %4 = vector.load %arg5[%c0_5, %c0_6, %c0_7] : memref<1x32x1xf32, #tpu.memory_space<vmem>>, vector<1x32x1xf32>
    %5 = vector.broadcast %4 : vector<1x32x1xf32> to vector<1x32x256xf32>
    %6 = arith.addf %3, %5 : vector<1x32x256xf32>
    %c0_8 = arith.constant 0 : index
    %c0_9 = arith.constant 0 : index
    %c0_10 = arith.constant 0 : index
    %7 = vector.load %arg6[%c0_8, %c0_9, %c0_10] : memref<1x1x256xf32, #tpu.memory_space<vmem>>, vector<1x1x256xf32>
    %8 = vector.broadcast %7 : vector<1x1x256xf32> to vector<1x32x256xf32>
    %9 = arith.mulf %6, %8 : vector<1x32x256xf32>
    %10 = arith.mulf %9, %0 : vector<1x32x256xf32>
    %11 = arith.addf %10, %0 : vector<1x32x256xf32>
    %c0_11 = arith.constant 0 : index
    %c0_12 = arith.constant 0 : index
    %c0_13 = arith.constant 0 : index
    %12 = vector.load %arg7[%c0_11, %c0_12, %c0_13] : memref<1x32x256xf32, #tpu.memory_space<vmem>>, vector<1x32x256xf32>
    tpu.vector_store %arg7[%c0_11, %c0_12, %c0_13], %11 {strides = array<i32>} : memref<1x32x256xf32, #tpu.memory_space<vmem>>, vector<1x32x256xf32>,
    return
  }
  func.func @transform_0(%arg0: i32, %arg1: i32, %arg2: i32) -> (i32, i32, i32) {
    %c0_i32 = arith.constant 0 : i32
    return %arg0, %arg1, %arg2 : i32, i32, i32
  }
  func.func @transform_1(%arg0: i32, %arg1: i32, %arg2: i32) -> (i32, i32, i32) {
    %c0_i32 = arith.constant 0 : i32
    %c0_i32_0 = arith.constant 0 : i32
    return %arg0, %arg1, %c0_i32 : i32, i32, i32
  }
  func.func @transform_2(%arg0: i32, %arg1: i32, %arg2: i32) -> (i32, i32, i32) {
    %c0_i32 = arith.constant 0 : i32
    %c0_i32_0 = arith.constant 0 : i32
    %c0_i32_1 = arith.constant 0 : i32
    return %c0_i32, %arg1, %c0_i32_0 : i32, i32, i32
  }
  func.func @transform_3(%arg0: i32, %arg1: i32, %arg2: i32) -> (i32, i32, i32) {
    %c0_i32 = arith.constant 0 : i32
    %c0_i32_0 = arith.constant 0 : i32
    return %arg0, %c0_i32, %arg2 : i32, i32, i32
  }
  func.func @transform_4(%arg0: i32, %arg1: i32, %arg2: i32) -> (i32, i32, i32) {
    %c0_i32 = arith.constant 0 : i32
    return %arg0, %arg1, %arg2 : i32, i32, i32
  }
}

</mosaic_0001>

<bundles_post_ra>
// kernel: bam_forward.3
= control target key start
LH: loop header
LB: loop body
LE: loop exit
PB: predicated region body
PF: predicated region fallthrough
CT: control target
= control target key end

     0   :  { %s476_s12 = smov 0   ;;  %s478_s13 = smov 0   ;;  %s515_s0 = inlined_call_operand.vmem [shape: f32[2,32,256], index: 0, kind: input, shape index: {}]   ;;  %s516_s1 = inlined_call_operand.vmem [shape: f32[8,32], index: 1, kind: input, shape index: {}]   ;;  %s517_s2 = inlined_call_operand.vmem [shape: f32[8,1], index: 2, kind: input, shape index: {}]   ;;  %s518_s3 = inlined_call_operand.vmem [shape: f32[2,8,256], index: 3, kind: output, shape index: {}]  }
   0x1   :  { %s480_s14 = smov 0  }
   0x2 LB: > { %s25_s15 = sadd.s32 1, %s448_s13  ;;  %p393_p0 = scmp.ge.s32.totalorder %s452_s14, 1  ;;  %s452_s14 = sphi %s480_s14, %s13_s14   ;;  %s448_s13 = sphi %s478_s13, %s520_s13   ;;  %s444_s12 = sphi %s476_s12, %s519_s12  }
   0x3   : > { %p27_p1 = scmp.ge.s32.totalorder %s25_s15, 2  ;;  %p158_p2 = scmp.lt.s32.totalorder %s452_s14, 3 }
   0x5   : > { %s522_s15 = smov (%p27_p1, %s25_s15), 0  ;;  %p159_p3 = pnand %p393_p0, %p158_p2 }
   0x6   : > { %p191_p4 = scmp.lt.s32.totalorder (!%p159_p3), %s444_s12, 1 }
   0x7   : > { %162 = sbr.rel (%p159_p3) target bundleno = 222 (0xde), region = 32 }
   0xc   : > { %v219_v0 = vld [vmem:[%s517_s2] sm:$0xff]  ;;  %v454_v1 = vmov 0.0   ;;  %v455_v2 = vmov 0   ;;  %s524_s12 = smov (!%p191_p4, %s444_s12), 1  ;;  %vm225_vm0 = vcmask 261120  }
   0xd   : > { %293 = vmatprep.mubr.f32.mxu0 %v454_v1  ;;  %429 = vset.pattern.permute.xlu0 %v455_v2  ;;  %s401_s18 = sshll.u32 %s524_s12, 6  ;;  %v218_v11 = vld [vmem:[%s516_s1] sm:$0xff]  ;;  %s402_s24 = sshll.u32 %s524_s12, 4 }
   0xe   : > { %222 = vperm.xlu0 %429, %v219_v0   ;;  %s198_s21 = scalar_lea.vmem %s515_s0, %s401_s18  ;;  %s208_s27 = scalar_lea.vmem %s518_s3, %s402_s24 }
   0xf   : > { %v217_v3 = vld [vmem:[%s198_s21 + $0x38] sm:$0xff]  ;;  %v216_v4 = vld [vmem:[%s198_s21 + $0x30] sm:$0xff]  ;;  %v215_v5 = vld [vmem:[%s198_s21 + $0x28] sm:$0xff] }
  0x10   : > { %253 = vmatprep.subr.mxu0 %v217_v3  ;;  %v214_v6 = vld [vmem:[%s198_s21 + $0x20] sm:$0xff]  ;;  %v213_v7 = vld [vmem:[%s198_s21 + $0x18] sm:$0xff]  ;;  %v212_v8 = vld [vmem:[%s198_s21 + $0x10] sm:$0xff] }
  0x11   : > { %254 = vmatpush1.msra.mxu0 %v216_v4  ;;  %v211_v9 = vld [vmem:[%s198_s21 + $0x8] sm:$0xff]  ;;  %v210_v10 = vld [vmem:[%s198_s21] sm:$0xff] }
  0x12   : > { %255 = vmatprep.subr.mxu0 %v215_v5 }
  0x13   : > { %256 = vmatpush1.msra.mxu0 %v214_v6 }
  0x14   : > { %257 = vmatprep.subr.mxu0 %v213_v7 }
  0x15   : > { %258 = vmatpush1.msra.mxu0 %v212_v8 }
  0x16   : > { %259 = vmatprep.subr.mxu0 %v211_v9 }
  0x17   : > { %260 = vmatpush1.msra.mxu0 %v210_v10 }
  0x18   : > { %398 = vmatmul.mubr.msk.f32.vlgmr.msra.gmra.mxu0 %vm225_vm0, %v218_v11 }
  0x89   : > { %v223_v12 = vpop.permute.xlu0 %222 }
  0xd8   : > { %v295_v13 = vpop.f32.mrf.mxu0 }
  0xd9   : > { %v296_v14 = vadd.f32 %v295_v13, %v223_v12 }
  0xda   : > { %v297_v15 = vpop.f32.mrf.mxu0 }
  0xdb   : > { %300 = vst [vmem:[%s208_s27] sm:$0xff] %v296_v14  ;;  %v298_v16 = vadd.f32 %v297_v15, %v223_v12 }
  0xdd   : > { %301 = vst [vmem:[%s208_s27 + $0x8] sm:$0xff] %v298_v16 }
  0xde PF: > { %s13_s14 = sadd.s32 1, %s452_s14   ;;  %s519_s12 = smov %s448_s13 }
  0xdf   : > { %p10_p5 = scmp.ge.s32.totalorder %s13_s14, 4   ;;  %s520_s13 = smov %s522_s15 }
  0xe1   :  { %12 = sbr.rel (!%p10_p5) target bundleno = 2 (0x2), region = 62 }

// kernel: bam_forward.5
= control target key start
LH: loop header
LB: loop body
LE: loop exit
PB: predicated region body
PF: predicated region fallthrough
CT: control target
= control target key end

     0   :  { %9 = vsyncpa [#allocation3], 0  ;;  %s943_s0 = inlined_call_operand.vmem [shape: f32[2,32,256], index: 0, kind: input, shape index: {}]   ;;  %s944_s1 = inlined_call_operand.vmem [shape: f32[2,32,1], index: 1, kind: input, shape index: {}]   ;;  %s945_s2 = inlined_call_operand.vmem [shape: f32[1,32,1], index: 2, kind: input, shape index: {}]   ;;  %s946_s3 = inlined_call_operand.vmem [shape: f32[2,1,256], index: 3, kind: input, shape index: {}]   ;;  %s947_s4 = inlined_call_operand.hbm [shape: f32[2,32,256], index: 4, kind: output, shape index: {}]  }
   0x1   :  { %11 = vsyncpa [#allocation3 + $0x1], 0  ;;  %s807_s15 = smov 0   ;;  %s809_s16 = smov 0  }
   0x2   :  { %s811_s17 = smov 0   ;;  %s813_s18 = smov 0  }
   0x3   :  { %s815_s19 = smov 0   ;;  %s817_s20 = smov 0  }
   0x4 LB: > { %s620_s21 = sadd.s32 4294967295, %s776_s20   ;;  %s621_s22 = sadd.s32 4294967294, %s776_s20   ;;  %s776_s20 = sphi %s817_s20, %s17_s20   ;;  %s772_s19 = sphi %s815_s19, %s954_s19   ;;  %s768_s18 = sphi %s813_s18, %s953_s18   ;;  %s764_s17 = sphi %s811_s17, %s952_s17   ;;  %s760_s16 = sphi %s809_s16, %s951_s16   ;;  %s756_s15 = sphi %s807_s15, %s950_s15  }
   0x5   : > { %s36_s23 = sadd.s32 1, %s772_s19  ;;  %s159_s24 = sadd.s32 1, %s764_s17 }
   0x6   : > { %p38_p0 = scmp.ge.s32.totalorder %s36_s23, 2  ;;  %p169_p1 = scmp.ne.s32.totalorder %s764_s17, %s760_s16 }
   0x7   : > { %p170_p2 = scmp.eq.s32.totalorder %s620_s21, 1  ;;  %p175_p3 = scmp.ne.s32.totalorder %s760_s16, %s756_s15 }
   0x8   : > { %s956_s23 = smov (%p38_p0, %s36_s23), 0  ;;  %p176_p5 = scmp.eq.s32.totalorder %s621_s22, 1 }
   0x9   : > { %p847_p4 = por %p170_p2, %p169_p1  ;;  %s152_s26 = ssub.s32 %s772_s19, %s956_s23 }
   0xa   : > { %p625_p6 = scmp.ge.s32.totalorder %s776_s20, 1  ;;  %p157_p7 = scmp.eq.s32.totalorder %s152_s26, 0 }
   0xb   : > { %p854_p8 = por %p176_p5, %p175_p3  ;;  %p247_p9 = scmp.lt.s32.totalorder %s776_s20, 3 }
   0xc   : > { %s860_s28 = scalar_select %p157_p7, %s764_s17, %s159_s24  }
   0xd   : > { %p248_p10 = pnand %p625_p6, %p247_p9 }
   0xe   : > { %p306_p11 = scmp.lt.s32.totalorder (!%p248_p10), %s768_s18, 1  ;;  %s639_s10 = sshll.u32 (!%p248_p10), %s768_s18, 10 }
   0xf   : > { %251 = sbr.rel (%p248_p10) target bundleno = 185 (0xb9), region = 36  ;;  %s892_s21 = scalar_lea.hbm (!%p248_p10), %s947_s4, %s639_s10 }
  0x14   : > { %v778_v0 = vmov 0   ;;  %s307_s29 = scalar_select %p306_p11, %s768_s18, 1  ;;  %v388_v5 = vld [vmem:[%s945_s2 + $0x8] sm:$0xff]  ;;  %v387_v6 = vld [vmem:[%s945_s2] sm:$0xff]  ;;  %v390_v7 = vld [vmem:[%s945_s2 + $0x18] sm:$0xff]  ;;  %v421_v9 = vlaneseq }
  0x15   : > { %699 = vset.pattern.permute.xlu1 %v778_v0  ;;  %698 = vset.pattern.permute.xlu0 %v778_v0  ;;  %v389_v8 = vld [vmem:[%s945_s2 + $0x10] sm:$0xff] }
  0x16   : > { %s638_s30 = sshll.u32 %s307_s29, 5  ;;  %s637_s22 = sshll.u32 %s307_s29, 6  ;;  %v422_v10 = vshrl.u32 %v421_v9, 7 }
  0x17   : > { %s328_s7 = scalar_lea.vmem %s944_s1, %s638_s30  ;;  %s631_s24 = sshll.u32 %s307_s29, 1 }
  0x18   : > { %v357_v1 = vld [vmem:[%s328_s7 + $0x10] sm:$0xff]  ;;  %v355_v2 = vld [vmem:[%s328_s7] sm:$0xff]  ;;  %v358_v3 = vld [vmem:[%s328_s7 + $0x18] sm:$0xff]  ;;  %s317_s5 = scalar_lea.vmem %s943_s0, %s637_s22  ;;  %s343_s8 = scalar_lea.vmem %s946_s3, %s631_s24  ;;  %v423_v13 = vsub.s32 0, %v422_v10  ;;  %v427_v14 = vsub.s32 1, %v422_v10 }
  0x19   : > { %371 = vperm.xlu1 %699, %v357_v1   ;;  %361 = vperm.xlu0 %698, %v355_v2   ;;  %v356_v4 = vld [vmem:[%s328_s7 + $0x8] sm:$0xff]  ;;  %v347_v15 = vld [vmem:[%s317_s5] sm:$0xff]  ;;  %v349_v20 = vld [vmem:[%s317_s5 + $0x10] sm:$0xff]  ;;  %s301_s29 = sand.u32 1, %s760_s16   ;;  %s779_s24 = smov [#allocation2]  }
  0x1a   : > { %v419_v16 = vld [vmem:[%s343_s8] sm:$0x3]  ;;  %v348_v17 = vld [vmem:[%s317_s5 + $0x8] sm:$0xff]  ;;  %v350_v21 = vld [vmem:[%s317_s5 + $0x18] sm:$0xff]  ;;  %s626_s9 = sshll.u32 %s301_s29, 6  ;;  %s898_s18 = scalar_lea.sflag [#allocation3], %s301_s29 }
  0x1b   : > { %v424_v22 = vrot.slane %v419_v16, %v423_v13  ;;  %v428_v23 = vrot.slane %v419_v16, %v427_v14  ;;  %v351_v28 = vld [vmem:[%s317_s5 + $0x20] sm:$0xff]  ;;  %v352_v31 = vld [vmem:[%s317_s5 + $0x28] sm:$0xff]  ;;  %v353_v32 = vld [vmem:[%s317_s5 + $0x30] sm:$0xff]  ;;  %s303_s11 = scalar_lea.vmem [#allocation2], %s626_s9  ;;  %s704_s26 = sshll.u32 %s779_s24, 4  ;;  %s705_s26 = int_to_ptr.vmem [resolvable:$false] %s704_s26 }
  0x1c   : > { %v354_v33 = vld [vmem:[%s317_s5 + $0x38] sm:$0xff]  ;;  %s482_s12 = sshll.u32 %s303_s11, 4  ;;  %s706_s30 = scalar_lea.vmem %s705_s26, 2048  ;;  %s894_s12 = int_to_ptr.vmem [resolvable:$true] %s482_s12 }
  0x1d   : > { %376 = vperm.xlu1 %699, %v358_v3   ;;  %366 = vperm.xlu0 %698, %v356_v4   ;;  %s700_s22 = scalar_lea.vmem %s894_s12, 1024  ;;  %p707_p1 = scmp.lt.s32.totalorder %s894_s12, %s705_s26 }
  0x1e   : > { %p701_p12 = scmp.ne.s32.totalorder %s894_s12, %s700_s22  ;;  %p708_p2 = scmp.lt.s32.totalorder %s706_s30, %s700_s22 }
  0x20   : > { %p702_p13 = pnand %p701_p12, %p847_p4  ;;  %p709_p3 = por %p708_p2, %p707_p1 }
  0x21   : > { %398 = vperm.xlu1 %699, %v388_v5   ;;  %393 = vperm.xlu0 %698, %v387_v6  }
  0x22   : > { %p703_p0 = pneg %p702_p13 }
  0x24   : > { %p710_p5 = pnand %p709_p3, %p703_p0 }
  0x25   : > { %408 = vperm.xlu1 %699, %v390_v7   ;;  %403 = vperm.xlu0 %698, %v389_v8  }
  0x94   : > { %v372_v11 = vpop.permute.xlu1 %371  ;;  %v362_v12 = vpop.permute.xlu0 %361 }
  0x95   : > { %v379_v24 = vmul.f32 %v362_v12, %v347_v15  ;;  %v380_v25 = vmul.f32 %v362_v12, %v348_v17  ;;  %v383_v42 = vmul.f32 %v372_v11, %v351_v28  ;;  %v384_v43 = vmul.f32 %v372_v11, %v352_v31 }
  0x98   : > { %v377_v18 = vpop.permute.xlu1 %376  ;;  %v367_v19 = vpop.permute.xlu0 %366 }
  0x99   : > { %v381_v26 = vmul.f32 %v367_v19, %v349_v20  ;;  %v382_v27 = vmul.f32 %v367_v19, %v350_v21  ;;  %v385_v44 = vmul.f32 %v377_v18, %v353_v32  ;;  %v386_v45 = vmul.f32 %v377_v18, %v354_v33 }
  0x9c   : > { %v399_v29 = vpop.permute.xlu1 %398  ;;  %v394_v30 = vpop.permute.xlu0 %393 }
  0x9d   : > { %v413_v34 = vadd.f32 %v399_v29, %v381_v26  ;;  %v414_v35 = vadd.f32 %v399_v29, %v382_v27  ;;  %v411_v36 = vadd.f32 %v394_v30, %v379_v24  ;;  %v412_v37 = vadd.f32 %v394_v30, %v380_v25 }
  0x9f   : > { %v433_v38 = vmul.f32 %v424_v22, %v413_v34  ;;  %v434_v39 = vmul.f32 %v428_v23, %v414_v35  ;;  %v431_v40 = vmul.f32 %v424_v22, %v411_v36  ;;  %v432_v41 = vmul.f32 %v428_v23, %v412_v37 }
  0xa0   : > { %v409_v46 = vpop.permute.xlu1 %408  ;;  %v404_v47 = vpop.permute.xlu0 %403 }
  0xa1   : > { %v441_v48 = vmul.f32 %v433_v38, %v349_v20  ;;  %v442_v49 = vmul.f32 %v434_v39, %v350_v21  ;;  %v439_v50 = vmul.f32 %v431_v40, %v347_v15  ;;  %v440_v51 = vmul.f32 %v432_v41, %v348_v17 }
  0xa2   : > { %v417_v52 = vadd.f32 %v409_v46, %v385_v44  ;;  %v418_v53 = vadd.f32 %v409_v46, %v386_v45  ;;  %v415_v54 = vadd.f32 %v404_v47, %v383_v42  ;;  %v416_v55 = vadd.f32 %v404_v47, %v384_v43 }
  0xa3   : > { %v449_v56 = vadd.f32 %v441_v48, %v349_v20  ;;  %v450_v57 = vadd.f32 %v442_v49, %v350_v21  ;;  %v447_v58 = vadd.f32 %v439_v50, %v347_v15  ;;  %v448_v59 = vadd.f32 %v440_v51, %v348_v17 }
  0xa4   : > { %v437_v60 = vmul.f32 %v424_v22, %v417_v52  ;;  %v438_v61 = vmul.f32 %v428_v23, %v418_v53  ;;  %v435_v62 = vmul.f32 %v424_v22, %v415_v54  ;;  %v436_v63 = vmul.f32 %v428_v23, %v416_v55 }
  0xa5   : > { %457 = vst [vmem:[%s303_s11 + $0x10] sm:$0xff] %v449_v56  ;;  %458 = vst [vmem:[%s303_s11 + $0x18] sm:$0xff] %v450_v57 }
  0xa6   : > { %455 = vst [vmem:[%s303_s11] sm:$0xff] %v447_v58  ;;  %456 = vst [vmem:[%s303_s11 + $0x8] sm:$0xff] %v448_v59  ;;  %v445_v0 = vmul.f32 %v437_v60, %v353_v32  ;;  %v446_v1 = vmul.f32 %v438_v61, %v354_v33  ;;  %v443_v2 = vmul.f32 %v435_v62, %v351_v28 }
  0xa7   : > { %v444_v3 = vmul.f32 %v436_v63, %v352_v31 }
  0xa8   : > { %v453_v4 = vadd.f32 %v445_v0, %v353_v32  ;;  %v454_v5 = vadd.f32 %v446_v1, %v354_v33  ;;  %v451_v6 = vadd.f32 %v443_v2, %v351_v28 }
  0xa9   : > { %v452_v7 = vadd.f32 %v444_v3, %v352_v31 }
  0xaa   : > { %461 = vst [vmem:[%s303_s11 + $0x30] sm:$0xff] %v453_v4  ;;  %462 = vst [vmem:[%s303_s11 + $0x38] sm:$0xff] %v454_v5 }
  0xab   : > { %459 = vst [vmem:[%s303_s11 + $0x20] sm:$0xff] %v451_v6  ;;  %460 = vst [vmem:[%s303_s11 + $0x28] sm:$0xff] %v452_v7 }
  0xac   : > { %713 = shalt.err (!%p710_p5)
}
  0xad   : > { %s714_s5 = scalar_lea.hbm %s892_s21, 1024  ;;  %s718_s8 = scalar_lea.hbm %s947_s4, 2048 }
  0xae   : > { %p715_p6 = scmp.ne.s32.totalorder %s892_s21, %s714_s5  ;;  %p719_p10 = scmp.lt.s32.totalorder %s892_s21, %s947_s4 }
  0xaf   : > { %p720_p11 = scmp.lt.s32.totalorder %s718_s8, %s714_s5 }
  0xb0   : > { %p716_p7 = pnand %p715_p6, %p847_p4 }
  0xb1   : > { %p721_p12 = por %p720_p11, %p719_p10 }
  0xb2   : > { %p717_p9 = pneg %p716_p7 }
  0xb4   : > { %p722_p13 = pnand %p721_p12, %p717_p9 }
  0xb6   : > { %725 = shalt.err (!%p722_p13)
}
  0xb7   : > { %s780_s10 = smov 256   ;;  %s781_s11 = smov 16  }
  0xb8   : > { %640 = dma.vmem_to_hbm [thread:$0]  (%p847_p4), %s894_s12, 1024, %s892_s21, %s898_s18, %s780_s10, %s780_s10, %s781_s11  }
  0xb9 PF: > { %p646_p0 = scmp.ge.s32.totalorder %s776_s20, 2  ;;  %s497_s13 = sand.u32 1, %s756_s15  }
  0xba   : > { %s498_s14 = scalar_lea.sflag [#allocation3], %s497_s13 }
  0xbb   : > { %p643_p1 = pnand %p646_p0, %p854_p8 }
  0xbd   : > { %p644_p2 = pneg %p643_p1 }
  0xbf   : > { %751 = dma.done.wait (%p644_p2), %s498_s14, 1024  }
  0xc0   : > { %753 = vsyncadd (%p644_p2), %s498_s14, 4294966272  ;;  %s17_s20 = sadd.s32 1, %s776_s20   ;;  %s950_s15 = smov %s760_s16 }
  0xc1   : > { %p14_p3 = scmp.ge.s32.totalorder %s17_s20, 4   ;;  %s951_s16 = smov %s764_s17 }
  0xc2   : > { %s952_s17 = smov %s860_s28  ;;  %s953_s18 = smov %s772_s19 }
  0xc3   : > { %s954_s19 = smov %s956_s23  ;;  %16 = sbr.rel (!%p14_p3) target bundleno = 4 (0x4), region = 80 }
  0xc8   :  { %503 = vsyncpa [#allocation3], 1 }
  0xc9   :  { %505 = vsyncpa [#allocation3 + $0x1], 1 }

// kernel: bam_forward.4
= control target key start
LH: loop header
LB: loop body
LE: loop exit
PB: predicated region body
PF: predicated region fallthrough
CT: control target
= control target key end

     0   :  { %s1087_s26 = smov 0   ;;  %s1188_s0 = inlined_call_operand.vmem [shape: f32[2,8,256], index: 0, kind: input, shape index: {}]   ;;  %s1189_s1 = inlined_call_operand.vmem [shape: f32[3,8,8], index: 1, kind: input, shape index: {}]   ;;  %s1190_s2 = inlined_call_operand.vmem [shape: f32[8,1], index: 2, kind: input, shape index: {}]   ;;  %s1191_s3 = inlined_call_operand.vmem [shape: f32[3,8,8], index: 3, kind: input, shape index: {}]   ;;  %s1192_s4 = inlined_call_operand.vmem [shape: f32[8,1], index: 4, kind: input, shape index: {}]   ;;  %s1193_s5 = inlined_call_operand.vmem [shape: f32[1,8], index: 5, kind: input, shape index: {}]   ;;  %s1194_s6 = inlined_call_operand.<no memory space> [shape: f32[1,1], index: 6, kind: input, shape index: {}]   ;;  %s1195_s7 = inlined_call_operand.vmem [shape: f32[2,1,256], index: 7, kind: output, shape index: {}]  }
   0x1   :  { %v12_v0 = vstv %s1194_s6 }
   0x2   :  { %13 = vst [vmem:[#allocation2] sm:$0x1] %v12_v0 }
   0x3 LB: > { %s988_s27 = sadd.s32 4294967295, %s1036_s26   ;;  %p992_p0 = scmp.ge.s32.totalorder %s1036_s26, 1  ;;  %s1036_s26 = sphi %s1087_s26, %s19_s26  }
   0x4   : > { %p239_p1 = scmp.lt.s32.totalorder %s1036_s26, 3 }
   0x6   : > { %p240_p2 = pnand %p992_p0, %p239_p1 }
   0x7   : > { %p270_p3 = scmp.lt.s32.totalorder (!%p240_p2), %s988_s27, 1  ;;  %s1038_s8 = smov (!%p240_p2), 4  }
   0x8   : > { %243 = sbr.rel (%p240_p2) target bundleno = 1113 (0x459), region = 48  ;;  %s1040_s9 = smov (!%p240_p2), 124  }
   0x9   : > { %s1041_s10 = smov (!%p240_p2), 120  }
   0xd   : > { %s1199_s27 = smov (!%p270_p3, %s988_s27), 1  ;;  %vm288_vm0 = vcmask 31744   ;;  %v1039_v4 = vmov 0.0   ;;  %vm311_vm2 = vcmask 64512   ;;  %v295_v10 = vld [vmem:[%s1189_s1] sm:$0xff]  ;;  %v1042_v12 = vmov 0  }
   0xe   : > { %s1013_s6 = sshll.u32 %s1199_s27, 4  ;;  %379 = vmatprep.mubr.f32.mxu0 %v1039_v4  ;;  %453 = vmatprep.mubr.f32.mxu1 %v1039_v4  ;;  %vm1110_vm1 = vmneg %vm288_vm0  ;;  %v281_v11 = vld [vmem:[%s1190_s2] sm:$0xff]  ;;  %vm306_vm3 = vcmask 1014784   ;;  %v996_v17 = vld [vmem:[%s1189_s1 + $0x8] sm:$0xff]  ;;  %vm468_vm4 = vcmask 982016  }
   0xf   : > { %s274_s30 = scalar_lea.vmem %s1188_s0, %s1013_s6  ;;  %1028 = vset.pattern.permute.xlu0 %v1042_v12  ;;  %1029 = vset.pattern.permute.xlu1 %v1042_v12  ;;  %v1001_v23 = vld [vmem:[%s1189_s1 + $0x10] sm:$0xff]  ;;  %v569_v43 = vld [vmem:[%s1191_s3] sm:$0xff]  ;;  %v1003_v50 = vld [vmem:[%s1191_s3 + $0x8] sm:$0xff] }
  0x10   : > { %v279_v1 = vld [vmem:[%s274_s30] sm:$0xff]  ;;  %v280_v2 = vld [vmem:[%s274_s30 + $0x8] sm:$0xff]  ;;  %v1008_v55 = vld [vmem:[%s1191_s3 + $0x10] sm:$0xff]  ;;  %s995_s30 = sshll.u32 %s1199_s27, 1 }
  0x11   : > { %284 = vrot.lane.b32.xlu0 %v279_v1, %s1038_s8  ;;  %v556_v44 = vld [vmem:[%s1192_s4] sm:$0xff] }
  0x12   : > { %v828_v57 = vld [vmem:[#allocation2] sm:$0x1] }
  0x15   : > { %286 = vrot.lane.b32.xlu0 %v280_v2, %s1038_s8 }
  0x83   : > { %v285_v3 = vpop.permute.xlu0 %284 }
  0x84   : > { %v293_v5 = vsel %vm288_vm0, 0.0, %v285_v3 }
  0x85   : > { %300 = vrot.lane.b32.xlu0 %v293_v5, %s1040_s9 }
  0x87   : > { %v287_v6 = vpop.permute.xlu0 %286 }
  0x88   : > { %v294_v7 = vsel %vm288_vm0, %v287_v6, 0.0  ;;  %v289_v8 = vsel %vm288_vm0, %v285_v3, %v287_v6 }
  0x89   : > { %466 = vrot.lane.b32.xlu0 %v294_v7, %s1041_s10  ;;  %302 = vrot.lane.b32.xlu1 %v289_v8, %s1040_s9 }
  0x8a   : > { %419 = vmatprep.subr.mxu1 %v289_v8 }
  0x8b   : > { %999 = vmatpush1.msk.msra.mxu1 %vm1110_vm1, %v285_v3 }
  0x8c   : > { %1000 = vmatmul.mubr.msk.f32.vlgmr.msra.gmra.mxu1 %vm311_vm2, %v295_v10 }
  0x8d   : > { %304 = vrot.lane.b32.xlu1 %v294_v7, %s1040_s9  ;;  %551 = vperm.xlu0 %1028, %v281_v11   ;;  %v827_v7 = vld [vmem:[%s1193_s5] sm:$0x1]  ;;  %v1043_v11 = vmov 1966171168  }
  0x8e   : > { %651 = vmatprep.mubr.f32.mxu1 %v1039_v4  ;;  %v916_v12 = vunpack.c.l.s4 %v1043_v11 }
  0x91   : > { %464 = vrot.lane.b32.xlu1 %v289_v8, %s1041_s10  ;;  %v834_v8 = vlaneseq }
  0x93   : > { %v835_v9 = vshrl.u32 %v834_v8, 7  ;;  %vm932_vm5 = vcmp.lt.s32.totalorder %v834_v8, 256 }
  0x95   : > { %462 = vrot.lane.b32.xlu1 %v293_v5, %s1041_s10  ;;  %v836_v10 = vsub.s32 0, %v835_v9 }
  0xf7   : > { %v301_v14 = vpop.permute.xlu0 %300 }
  0xfb   : > { %v303_v13 = vpop.permute.xlu1 %302  ;;  %v467_v19 = vpop.permute.xlu0 %466 }
  0xfc   : > { %v307_v18 = vsel %vm306_vm3, %v301_v14, %v303_v13 }
  0xff   : > { %v305_v15 = vpop.permute.xlu1 %304 }
 0x100   : > { %v308_v16 = vsel %vm306_vm3, %v303_v13, %v305_v15  ;;  %v917_v15 = vunpack.c.0.s8 %v916_v12 }
 0x101   : > { %345 = vmatprep.subr.mxu0 %v308_v16 }
 0x102   : > { %346 = vmatpush1.msra.mxu0 %v307_v18 }
 0x103   : > { %v465_v20 = vpop.permute.xlu1 %464  ;;  %997 = vmatmul.mubr.msk.f32.vlgmr.msra.gmra.mxu0 %vm311_vm2, %v996_v17 }
 0x104   : > { %v470_v21 = vsel %vm468_vm4, %v465_v20, %v467_v19  ;;  %540 = vmatprep.mubr.f32.mxu0 %v1039_v4 }
 0x105   : > { %506 = vmatprep.subr.mxu0 %v470_v21 }
 0x107   : > { %v463_v22 = vpop.permute.xlu1 %462 }
 0x108   : > { %v469_v24 = vsel %vm468_vm4, %v463_v22, %v465_v20  ;;  %v552_v31 = vpop.permute.xlu0 %551  ;;  %v920_v20 = vsub.s32 %v917_v15, %v835_v9 }
 0x109   : > { %507 = vmatpush1.msra.mxu0 %v469_v24 }
 0x10a   : > { %1002 = vmatmul.mubr.msk.f32.vlgmr.msra.gmra.mxu0 %vm311_vm2, %v1001_v23 }
 0x10b   : > { %725 = vmatprep.mubr.f32.mxu0 %v1039_v4 }
 0x14c   : > { %v455_v26 = vpop.f32.mrf.mxu1 }
 0x14e   : > { %v457_v28 = vpop.f32.mrf.mxu1 }
 0x1c3   : > { %v381_v25 = vpop.f32.mrf.mxu0 }
 0x1c4   : > { %v456_v29 = vadd.f32 %v455_v26, %v381_v25 }
 0x1c5   : > { %v383_v27 = vpop.f32.mrf.mxu0 }
 0x1c6   : > { %v458_v32 = vadd.f32 %v457_v28, %v383_v27 }
 0x1ca   : > { %v542_v30 = vpop.f32.mrf.mxu0 }
 0x1cb   : > { %v547_v33 = vadd.f32 %v542_v30, %v456_v29 }
 0x1cc   : > { %v544_v34 = vpop.f32.mrf.mxu0 }
 0x1cd   : > { %v548_v35 = vadd.f32 %v544_v34, %v458_v32  ;;  %v554_v36 = vadd.f32 %v552_v31, %v547_v33 }
 0x1cf   : > { %559 = vrot.lane.b32.xlu1 %v554_v36, %s1038_s8  ;;  %v555_v37 = vadd.f32 %v552_v31, %v548_v35 }
 0x1d3   : > { %561 = vrot.lane.b32.xlu1 %v555_v37, %s1038_s8 }
 0x241   : > { %v560_v38 = vpop.permute.xlu1 %559 }
 0x242   : > { %v567_v39 = vsel %vm288_vm0, 0.0, %v560_v38 }
 0x243   : > { %574 = vrot.lane.b32.xlu0 %v567_v39, %s1040_s9 }
 0x245   : > { %v562_v40 = vpop.permute.xlu1 %561 }
 0x246   : > { %v568_v41 = vsel %vm288_vm0, %v562_v40, 0.0  ;;  %v563_v42 = vsel %vm288_vm0, %v560_v38, %v562_v40 }
 0x247   : > { %578 = vrot.lane.b32.xlu1 %v568_v41, %s1040_s9  ;;  %576 = vrot.lane.b32.xlu0 %v563_v42, %s1040_s9 }
 0x248   : > { %691 = vmatprep.subr.mxu0 %v563_v42 }
 0x249   : > { %1006 = vmatpush1.msk.msra.mxu0 %vm1110_vm1, %v560_v38 }
 0x24a   : > { %1007 = vmatmul.mubr.msk.f32.vlgmr.msra.gmra.mxu0 %vm311_vm2, %v569_v43 }
 0x24b   : > { %736 = vrot.lane.b32.xlu1 %v563_v42, %s1041_s10  ;;  %738 = vrot.lane.b32.xlu0 %v568_v41, %s1041_s10 }
 0x24c   : > { %905 = vmatprep.mubr.f32.mxu0 %v1039_v4 }
 0x24f   : > { %734 = vrot.lane.b32.xlu1 %v567_v39, %s1041_s10  ;;  %822 = vperm.xlu0 %1028, %v556_v44   ;;  %s278_s10 = scalar_lea.vmem %s1195_s7, %s995_s30 }
 0x253   : > { %831 = vperm.xlu1 %1029, %v828_v57  }
 0x2b5   : > { %v575_v45 = vpop.permute.xlu0 %574 }
 0x2b9   : > { %v579_v46 = vpop.permute.xlu1 %578  ;;  %v577_v47 = vpop.permute.xlu0 %576 }
 0x2ba   : > { %v580_v48 = vsel %vm306_vm3, %v575_v45, %v577_v47  ;;  %v581_v49 = vsel %vm306_vm3, %v577_v47, %v579_v46 }
 0x2bb   : > { %617 = vmatprep.subr.mxu1 %v581_v49 }
 0x2bc   : > { %618 = vmatpush1.msra.mxu1 %v580_v48 }
 0x2bd   : > { %v737_v51 = vpop.permute.xlu1 %736  ;;  %v739_v52 = vpop.permute.xlu0 %738  ;;  %1004 = vmatmul.mubr.msk.f32.vlgmr.msra.gmra.mxu1 %vm311_vm2, %v1003_v50 }
 0x2be   : > { %v741_v53 = vsel %vm468_vm4, %v737_v51, %v739_v52  ;;  %811 = vmatprep.mubr.f32.mxu1 %v1039_v4 }
 0x2bf   : > { %777 = vmatprep.subr.mxu1 %v741_v53 }
 0x2c1   : > { %v735_v54 = vpop.permute.xlu1 %734 }
 0x2c2   : > { %v740_v56 = vsel %vm468_vm4, %v735_v54, %v737_v51 }
 0x2c3   : > { %778 = vmatpush1.msra.mxu1 %v740_v56 }
 0x2c4   : > { %1009 = vmatmul.mubr.msk.f32.vlgmr.msra.gmra.mxu1 %vm311_vm2, %v1008_v55 }
 0x2ca   : > { %v823_v4 = vpop.permute.xlu0 %822 }
 0x2ce   : > { %v832_v13 = vpop.permute.xlu1 %831 }
 0x2cf   : > { %v837_v14 = vrot.slane %v832_v13, %v836_v10 }
 0x30a   : > { %v727_v59 = vpop.f32.mrf.mxu0 }
 0x30c   : > { %v729_v61 = vpop.f32.mrf.mxu0 }
 0x37d   : > { %v653_v58 = vpop.f32.mrf.mxu1 }
 0x37e   : > { %v728_v62 = vadd.f32 %v727_v59, %v653_v58 }
 0x37f   : > { %v655_v60 = vpop.f32.mrf.mxu1 }
 0x380   : > { %v730_v0 = vadd.f32 %v729_v61, %v655_v60 }
 0x384   : > { %v813_v63 = vpop.f32.mrf.mxu1 }
 0x385   : > { %v818_v1 = vadd.f32 %v813_v63, %v728_v62 }
 0x386   : > { %v815_v2 = vpop.f32.mrf.mxu1 }
 0x387   : > { %v819_v3 = vadd.f32 %v815_v2, %v730_v0  ;;  %v825_v6 = vadd.f32 %v823_v4, %v818_v1 }
 0x389   : > { %v826_v5 = vadd.f32 %v823_v4, %v819_v3 }
 0x38b   : > { %871 = vmatprep.subr.mxu0 %v826_v5 }
 0x38c   : > { %872 = vmatpush1.msra.mxu0 %v825_v6 }
 0x38d   : > { %1010 = vmatmul.mubr.msk.f32.vlgmr.msra.gmra.mxu0 %vm311_vm2, %v827_v7 }
 0x44d   : > { %v907_v16 = vpop.f32.mrf.mxu0 }
 0x44e   : > { %v908_v18 = vadd.f32 %v907_v16, %v837_v14 }
 0x44f   : > { %v909_v17 = vpop.f32.mrf.mxu0 }
 0x450   : > { %v910_v19 = vadd.f32 %v909_v17, %v837_v14 }
 0x452   : > { %v914_v21 = vcombine.low %v908_v18, %v910_v19 }
 0x454   : > { %v921_v22 = vrot.slane %v914_v21, %v920_v20 }
 0x456   : > { %v928_v23 = vrot.slane %v921_v22, %v920_v20 }
 0x458   : > { %934 = vst.msk [vmem:[%s278_s10] sm:$0x3] %vm932_vm5, %v928_v23 }
 0x459 PF: > { %s19_s26 = sadd.s32 1, %s1036_s26  }
 0x45a   : > { %p16_p4 = scmp.ge.s32.totalorder %s19_s26, 4  }
 0x45c   :  { %18 = sbr.rel (!%p16_p4) target bundleno = 3 (0x3), region = 82 }

</bundles_post_ra>
